<compile_context>
chip_gen: v6e
topology: v6e:2x2x1
jax: 0.10.0
libtpu: 0.0.40
codegen_flags: <defaults>
</compile_context>

<pallas_src>
import jax
import jax.numpy as jnp
from jax.experimental import pallas as pl
from jax.experimental.pallas import tpu as pltpu

# The "half" dtype used by the AMP wrapper on TPU.
AMP_DTYPE = jnp.bfloat16


def _round_up(x: int, m: int) -> int:
    return ((x + m - 1) // m) * m


def _vmem_capacity_bytes() -> int:
    """Trace-time VMEM capacity; conservative fallback if unavailable."""
    try:
        return int(pltpu.get_tpu_info().vmem_capacity_bytes)
    except Exception:
        return 64 << 20  # v7x per-TensorCore (the smallest of the three gens)


# ----------------------------------------------------------------------------
# Kernels
# ----------------------------------------------------------------------------
def _amp_linear_kernel(x_ref, w_ref, b_ref, o_ref, acc_ref):
    """One (tm, tn) output tile of  to_fp32(bias + to_half(x) @ W_half).

    x_ref  : (tm, tk) bf16 input tile (AMP cast done in the wrapper)
    w_ref  : (tk, tn) bf16  (model.half() weight, pre-transposed to (D_in, D_out))
    b_ref  : (1,  tn) bf16
    o_ref  : (tm, tn) fp32 (output_to_fp32=True) or bf16
    acc_ref: (tm, tn) f32 VMEM accumulator, resident across the K grid axis
    """
    k = pl.program_id(2)

    @pl.when(k == 0)
    def _():
        acc_ref[...] = jnp.zeros_like(acc_ref)

    # Safety no-op cast (x is already bf16 from the wrapper's AMP cast).
    x = x_ref[...].astype(AMP_DTYPE)
    # bf16 x bf16 with f32 accumulation: native MXU mode, matching the
    # "half weights, fp32 accumulate" semantics of a .half() nn.Linear.
    acc_ref[...] += jnp.dot(x, w_ref[...], preferred_element_type=jnp.float32)

    @pl.when(k == pl.num_programs(2) - 1)
    def _():
        y = acc_ref[...] + b_ref[...].astype(jnp.float32)
        # The inner half model emits the half dtype; NaiveAMPModel then casts
        # half -> fp32.  Round through the half dtype to reproduce that.
        o_ref[...] = y.astype(AMP_DTYPE).astype(o_ref.dtype)


def _amp_linear_kernel_single_k(x_ref, w_ref, b_ref, o_ref):
    """Single-K-step fast path: no accumulator scratch, no pl.when branches."""
    x = x_ref[...].astype(AMP_DTYPE)
    y = jnp.dot(x, w_ref[...], preferred_element_type=jnp.float32)
    y = y + b_ref[...].astype(jnp.float32)
    o_ref[...] = y.astype(AMP_DTYPE).astype(o_ref.dtype)


# ----------------------------------------------------------------------------
# Tile selection (generation aware)
# ----------------------------------------------------------------------------
def _select_tiles(M, N, K, out_bytes, tm, tn, tk):
    # Clamp to the (padded) problem size, keeping hardware-friendly multiples:
    # tm multiple of 16 (bf16 sublane packing), tn/tk multiples of 128 (lanes).
    tm = min(tm, _round_up(M, 16))
    tn = min(tn, _round_up(N, 128))
    tk = min(tk, _round_up(K, 128))

    # Megacore (v7x 2 TCs): keep >= 2 output blocks across the two "parallel"
    # grid axes when the problem allows it, instead of collapsing M and N to a
    # single block and leaving one TensorCore idle.
    if (_round_up(M, tm) // tm) * (_round_up(N, tn) // tn) < 2:
        n_lanes = _round_up(N, 128) // 128
        m_rows = _round_up(M, 16) // 16
        if n_lanes >= 2:
            tn = ((n_lanes + 1) // 2) * 128
        elif m_rows >= 2:
            tm = ((m_rows + 1) // 2) * 16

    # Shrink until the double-buffered working set fits comfortably in scoped
    # VMEM (v7x: 64 MiB physical; v5e/v6e: 128 MiB).
    budget = int(0.45 * _vmem_capacity_bytes())

    def working_set(tm_, tn_, tk_):
        multi_k = _round_up(K, tk_) > tk_
        ws = 2 * (tm_ * tk_ * 2 + tk_ * tn_ * 2 + tm_ * tn_ * out_bytes) + 4 * tn_
        if multi_k:
            ws += tm_ * tn_ * 4  # f32 accumulator scratch
        return ws

    while working_set(tm, tn, tk) > budget:
        if tk > 256:
            tk = max(256, _round_up(tk // 2, 128))
        elif tm > 128:
            tm = max(128, _round_up(tm // 2, 16))
        elif tn > 128:
            tn = max(128, _round_up(tn // 2, 128))
        else:
            break
    return tm, tn, tk


# ----------------------------------------------------------------------------
# Forward wrapper
# ----------------------------------------------------------------------------
def naive_amp_forward(x, w_half, b_half, *, output_to_fp32=True,
                      tm=512, tn=512, tk=1024):
    """Equivalent of NaiveAMPModel(nn.Linear(D_in, D_out)).forward(x).

    x      : (B, D_in)       fp32 (AMP-cast here) or bf16
    w_half : (D_in, D_out)   bf16 (torch weight (D_out, D_in) pre-transposed)
    b_half : (1, D_out)      bf16
    """
    M, K = x.shape
    Kw, N = w_half.shape
    assert K == Kw
    assert b_half.shape == (1, N)

    out_dtype = jnp.float32 if output_to_fp32 else AMP_DTYPE
    out_bytes = 4 if output_to_fp32 else 2

    tm, tn, tk = _select_tiles(M, N, K, out_bytes, tm, tn, tk)
    Mp, Kp, Np = _round_up(M, tm), _round_up(K, tk), _round_up(N, tn)

    # AMP input cast (fp32 -> half) done once here; XLA fuses it with the pad.
    # The kernel then streams half-width x from HBM on every j re-read.
    x = x.astype(AMP_DTYPE)
    if (Mp, Kp) != (M, K):
        x = jnp.pad(x, ((0, Mp - M), (0, Kp - K)))
    if (Kp, Np) != (K, N):
        w_half = jnp.pad(w_half, ((0, Kp - K), (0, Np - N)))
    if Np != N:
        b_half = jnp.pad(b_half, ((0, 0), (0, Np - N)))

    cost = pl.CostEstimate(
        flops=2 * Mp * Kp * Np,
        transcendentals=0,
        bytes_accessed=(Mp * Kp * 2 + Kp * Np * 2 + Np * 2 + Mp * Np * out_bytes),
    )

    single_k = (Kp == tk)

    needed = (2 * (tm * tk * 2 + tk * tn * 2 + tm * tn * out_bytes)
              + 4 * tn + (0 if single_k else tm * tn * 4))
    vmem_limit = int(min(0.9 * _vmem_capacity_bytes(),
                         max(needed + (8 << 20), 32 << 20)))

    if single_k:
        out = pl.pallas_call(
            _amp_linear_kernel_single_k,
            out_shape=jax.ShapeDtypeStruct((Mp, Np), out_dtype),
            grid_spec=pltpu.PrefetchScalarGridSpec(
                num_scalar_prefetch=0,
                grid=(Mp // tm, Np // tn),
                in_specs=[
                    pl.BlockSpec((tm, Kp), lambda i, j: (i, 0)),
                    pl.BlockSpec((Kp, tn), lambda i, j: (0, j)),
                    pl.BlockSpec((1, tn), lambda i, j: (0, j)),
                ],
                out_specs=pl.BlockSpec((tm, tn), lambda i, j: (i, j)),
            ),
            compiler_params=pltpu.CompilerParams(
                dimension_semantics=("parallel", "parallel"),
                vmem_limit_bytes=vmem_limit,
            ),
            cost_estimate=cost,
        )(x, w_half, b_half)
    else:
        out = pl.pallas_call(
            _amp_linear_kernel,
            out_shape=jax.ShapeDtypeStruct((Mp, Np), out_dtype),
            grid_spec=pltpu.PrefetchScalarGridSpec(
                num_scalar_prefetch=0,
                grid=(Mp // tm, Np // tn, Kp // tk),
                in_specs=[
                    pl.BlockSpec((tm, tk), lambda i, j, k: (i, k)),
                    pl.BlockSpec((tk, tn), lambda i, j, k: (k, j)),
                    pl.BlockSpec((1, tn), lambda i, j, k: (0, j)),
                ],
                out_specs=pl.BlockSpec((tm, tn), lambda i, j, k: (i, j)),
                scratch_shapes=[pltpu.VMEM((tm, tn), jnp.float32)],
            ),
            compiler_params=pltpu.CompilerParams(
                dimension_semantics=("parallel", "parallel", "arbitrary"),
                vmem_limit_bytes=vmem_limit,
            ),
            cost_estimate=cost,
        )(x, w_half, b_half)

    if (Mp, Np) != (M, N):
        out = out[:M, :N]
    return out


if __name__ == "__main__":
    # Small shapes, big enough to exercise padding, the megacore split of the
    # N axis, the single-K fast path, and (with a small tk) the K-accumulator
    # path.
    B, D_IN, D_OUT = 256, 512, 384

    key = jax.random.PRNGKey(0)
    kx, kw, kb = jax.random.split(key, 3)

    # fp32 activation: NaiveAMPModel casts it to the half dtype.
    x = jax.random.normal(kx, (B, D_IN), dtype=jnp.float32)

    # "Pretrained" fp32 params, then model.half() -> half dtype.
    # torch Linear weight is (D_out, D_in); transpose once to (D_in, D_out).
    w_f32 = jax.random.normal(kw, (D_OUT, D_IN), dtype=jnp.float32) * 0.05
    b_f32 = jax.random.normal(kb, (D_OUT,), dtype=jnp.float32) * 0.1
    w_half = w_f32.T.astype(AMP_DTYPE)                    # (D_in, D_out) bf16
    b_half = b_f32.reshape(1, D_OUT).astype(AMP_DTYPE)    # (1, D_out)    bf16

    # Pure-JAX reference of the same AMP pipeline.
    x_half = x.astype(AMP_DTYPE)
    ref = (
        jnp.dot(x_half, w_half, preferred_element_type=jnp.float32)
        + b_half.astype(jnp.float32)
    ).astype(AMP_DTYPE).astype(jnp.float32)

    # 1) Default large-tile config: K fits one tile -> single-K fast path.
    out1 = naive_amp_forward(x, w_half, b_half, output_to_fp32=True)
    out1 = jax.block_until_ready(out1)
    assert out1.shape == (B, D_OUT) and out1.dtype == jnp.float32
    assert jnp.allclose(out1, ref, atol=2e-2, rtol=2e-2), float(
        jnp.max(jnp.abs(out1 - ref)))

    # 2) Force a multi-step K grid to exercise the f32 accumulator path.
    out2 = naive_amp_forward(x, w_half, b_half, output_to_fp32=True,
                             tm=256, tn=256, tk=256)
    out2 = jax.block_until_ready(out2)
    assert out2.shape == (B, D_OUT) and out2.dtype == jnp.float32
    assert jnp.allclose(out2, ref, atol=2e-2, rtol=2e-2), float(
        jnp.max(jnp.abs(out2 - ref)))

    print("KERNEL_OK")
</pallas_src>

<mosaic_0001>
module attributes {stable_mosaic.version = 11 : i64} {
  func.func @_amp_linear_kernel_single_k(%arg0: i32, %arg1: i32, %arg2: memref<256x512xbf16, #tpu.memory_space<vmem>>, %arg3: memref<512x256xbf16, #tpu.memory_space<vmem>>, %arg4: memref<1x256xbf16, #tpu.memory_space<vmem>>, %arg5: memref<256x256xf32, #tpu.memory_space<vmem>>) attributes {dimension_semantics = [#tpu.dimension_semantics<parallel>, #tpu.dimension_semantics<parallel>], iteration_bounds = array<i64: 1, 2>, scalar_prefetch = 0 : i64, scratch_operands = 0 : i64, tpu.core_type = #tpu.core_type<tc>, window_params = [{transform_indices = @transform_0, window_bounds = array<i64: 256, 512>}, {transform_indices = @transform_1, window_bounds = array<i64: 512, 256>}, {transform_indices = @transform_2, window_bounds = array<i64: 1, 256>}, {transform_indices = @transform_3, window_bounds = array<i64: 256, 256>}]} {
    %c0 = arith.constant 0 : index
    %c0_0 = arith.constant 0 : index
    %0 = vector.load %arg2[%c0, %c0_0] : memref<256x512xbf16, #tpu.memory_space<vmem>>, vector<256x512xbf16>
    %c0_1 = arith.constant 0 : index
    %c0_2 = arith.constant 0 : index
    %1 = vector.load %arg3[%c0_1, %c0_2] : memref<512x256xbf16, #tpu.memory_space<vmem>>, vector<512x256xbf16>
    %cst = arith.constant dense<0.000000e+00> : vector<256x256xf32>
    %2 = tpu.matmul %0, %1, %cst {dimension_numbers = #tpu.dot_dimension_numbers<[1], [0], [0], [1], [0, 0, 1, 1], [], []>} : vector<256x512xbf16>, vector<512x256xbf16>, vector<256x256xf32> -> vector<256x256xf32>
    %c0_3 = arith.constant 0 : index
    %c0_4 = arith.constant 0 : index
    %3 = vector.load %arg4[%c0_3, %c0_4] : memref<1x256xbf16, #tpu.memory_space<vmem>>, vector<1x256xbf16>
    %4 = arith.extf %3 : vector<1x256xbf16> to vector<1x256xf32>
    %5 = vector.broadcast %4 : vector<1x256xf32> to vector<256x256xf32>
    %6 = arith.addf %2, %5 : vector<256x256xf32>
    %7 = arith.truncf %6 : vector<256x256xf32> to vector<256x256xbf16>
    %8 = arith.extf %7 : vector<256x256xbf16> to vector<256x256xf32>
    %c0_5 = arith.constant 0 : index
    %c0_6 = arith.constant 0 : index
    %9 = vector.load %arg5[%c0_5, %c0_6] : memref<256x256xf32, #tpu.memory_space<vmem>>, vector<256x256xf32>
    tpu.vector_store %arg5[%c0_5, %c0_6], %8 {strides = array<i32>} : memref<256x256xf32, #tpu.memory_space<vmem>>, vector<256x256xf32>,
    return
  }
  func.func @transform_0(%arg0: i32, %arg1: i32) -> (i32, i32) {
    %c0_i32 = arith.constant 0 : i32
    %c0_i32_0 = arith.constant 0 : i32
    return %arg0, %c0_i32 : i32, i32
  }
  func.func @transform_1(%arg0: i32, %arg1: i32) -> (i32, i32) {
    %c0_i32 = arith.constant 0 : i32
    %c0_i32_0 = arith.constant 0 : i32
    return %c0_i32, %arg1 : i32, i32
  }
  func.func @transform_2(%arg0: i32, %arg1: i32) -> (i32, i32) {
    %c0_i32 = arith.constant 0 : i32
    %c0_i32_0 = arith.constant 0 : i32
    return %c0_i32, %arg1 : i32, i32
  }
  func.func @transform_3(%arg0: i32, %arg1: i32) -> (i32, i32) {
    %c0_i32 = arith.constant 0 : i32
    return %arg0, %arg1 : i32, i32
  }
}

</mosaic_0001>

<bundles_post_ra>
// kernel: tpu_custom_call.1
= control target key start
LH: loop header
LB: loop body
LE: loop exit
PB: predicated region body
PF: predicated region fallthrough
CT: control target
= control target key end

     0   :  { %8 = vsyncpa [#allocation3], 0  ;;  %s2776_s0 = inlined_call_operand.hbm [shape: bf16[256,512], index: 0, kind: input, shape index: {}]   ;;  %s2777_s1 = inlined_call_operand.hbm [shape: bf16[512,512], index: 1, kind: input, shape index: {}]   ;;  %s2778_s2 = inlined_call_operand.hbm [shape: bf16[1,512], index: 2, kind: input, shape index: {}]   ;;  %s2779_s3 = inlined_call_operand.hbm [shape: f32[256,512], index: 3, kind: output, shape index: {}]  }
   0x1   :  { %9 = vsyncpa [#allocation6], 0 }
   0x2   :  { %11 = vsyncpa [#allocation6 + $0x1], 0 }
   0x3   :  { %12 = vsyncpa [#allocation4], 0 }
   0x4   :  { %14 = vsyncpa [#allocation4 + $0x1], 0  ;;  %s2365_s12 = smov 0   ;;  %s2367_s13 = smov 0  }
   0x5   :  { %s2369_s14 = smov 0   ;;  %s2371_s15 = smov 0  }
   0x6   :  { %s2373_s16 = smov 0   ;;  %s2375_s17 = smov 0  }
   0x7 LB: > { %s29_s18 = sadd.s32 1, %s2328_s16  ;;  %s65_s19 = sadd.s32 1, %s2320_s14  ;;  %s2332_s17 = sphi %s2375_s17, %s20_s17   ;;  %s2328_s16 = sphi %s2373_s16, %s2797_s16   ;;  %s2324_s15 = sphi %s2371_s15, %s2796_s15   ;;  %s2320_s14 = sphi %s2369_s14, %s2795_s14   ;;  %s2316_s13 = sphi %s2367_s13, %s2794_s13   ;;  %s2312_s12 = sphi %s2365_s12, %s2793_s12  }
   0x8   : > { %p30_p0 = scmp.ge.s32.totalorder %s29_s18, 2  ;;  %p72_p1 = scmp.ne.s32.totalorder %s2320_s14, %s2316_s13 }
   0x9   : > { %p73_p2 = scmp.eq.s32.totalorder %s2332_s17, 0  ;;  %p1915_p5 = scmp.lt.s32.totalorder %s2332_s17, 2 }
   0xa   : > { %s2799_s18 = smov (%p30_p0, %s29_s18), 0  ;;  %s173_s22 = sand.u32 1, %s2332_s17  }
   0xb   : > { %p2405_p3 = por %p73_p2, %p72_p1  ;;  %s62_s21 = ssub.s32 %s2328_s16, %s2799_s18 }
   0xc   : > { %p63_p6 = scmp.eq.s32.totalorder %s62_s21, 0  ;;  %s175_s23 = sand.u32 1, %s2320_s14  }
   0xd   : > { %s1742_s25 = sshll.u32 %s175_s23, 9  ;;  %s1886_s26 = sshll.u32 %s2328_s16, 7 }
   0xe   : > { %s2416_s24 = scalar_select %p63_p6, %s2320_s14, %s65_s19  }
   0xf   : > { %s183_s29 = scalar_lea.hbm %s2777_s1, %s1886_s26  ;;  %s177_s30 = scalar_lea.vmem [#allocation5], %s1742_s25 }
  0x10   : > { %s184_s4 = sshll.u32 %s177_s30, 4  ;;  %p2426_p7 = pnand %p1915_p5, %p2405_p3  ;;  %s185_s4 = int_to_ptr.vmem [resolvable:$true] %s184_s4 }
  0x11   : > { %s2430_s6 = scalar_lea.sflag [#allocation6], %s173_s22  ;;  %s2179_s7 = scalar_lea.vmem %s185_s4, 8192 }
  0x12   : > { %p2780_p8 = pneg %p2426_p7  ;;  %p2180_p9 = scmp.ne.s32.totalorder %s185_s4, %s2179_s7 }
  0x13   : > { %s2334_s8 = smov [#allocation5]  }
  0x14   : > { %p2182_p10 = pnand %p2180_p9, %p2780_p8  ;;  %s2184_s9 = sshll.u32 %s2334_s8, 4  ;;  %s2185_s9 = int_to_ptr.vmem [resolvable:$false] %s2184_s9 }
  0x15   : > { %s2186_s10 = scalar_lea.vmem %s2185_s9, 16384  ;;  %p2187_p12 = scmp.lt.s32.totalorder %s185_s4, %s2185_s9 }
  0x16   : > { %p2183_p11 = pneg %p2182_p10  ;;  %p2188_p13 = scmp.lt.s32.totalorder %s2186_s10, %s2179_s7 }
  0x18   : > { %p2189_p0 = por %p2188_p13, %p2187_p12 }
  0x1a   : > { %p2190_p2 = pnand %p2189_p0, %p2183_p11 }
  0x1c   : > { %2193 = shalt.err (!%p2190_p2)
}
  0x1d   : > { %s2335_s11 = smov 256   ;;  %s2336_s19 = smov 128  }
  0x1e   : > { %s2337_s20 = smov 8   ;;  %s2442_s21 = sadd.s32 4294967295, %s2332_s17  }
  0x1f   : > { %1906 = dma.hbm_to_vmem [thread:$0]  (!%p2426_p7), %s183_s29, 8192, %s185_s4, %s2430_s6, %s2335_s11, %s2336_s19, %s2337_s20  }
  0x20   : > { %s1738_s22 = sadd.s32 4294967294, %s2332_s17   ;;  %p78_p3 = scmp.ne.s32.totalorder %s2316_s13, %s2312_s12 }
  0x21   : > { %p79_p5 = scmp.eq.s32.totalorder %s2442_s21, 0  ;;  %p130_p6 = scmp.eq.s32.totalorder %s2442_s21, 1 }
  0x22   : > { %p136_p9 = scmp.eq.s32.totalorder %s1738_s22, 1  ;;  %p1739_p11 = scmp.ge.s32.totalorder %s2332_s17, 1 }
  0x23   : > { %p2451_p10 = por %p79_p5, %p78_p3  ;;  %p2459_p12 = por %p130_p6, %p72_p1 }
  0x24   : > { %p2463_p13 = por %p136_p9, %p78_p3  ;;  %p143_p0 = scmp.lt.s32.totalorder %s2332_s17, 3 }
  0x25   : > { %s2785_s26 = scalar_select %p2459_p12, 1, 0 }
  0x26   : > { %s2786_s27 = scalar_select %p2463_p13, 1, 0 }
  0x27   : > { %p2468_p2 = pnand %p1739_p11, %p143_p0  ;;  %s2338_s29 = smov [#allocation2]  }
  0x28   : > { %s159_s30 = sshll.u32 %s2338_s29, 4  ;;  %s1745_s4 = sshll.u32 %s175_s23, 1  ;;  %s160_s30 = int_to_ptr.vmem [resolvable:$true] %s159_s30 }
  0x29   : > { %p1899_p4 = pneg %p2468_p2  ;;  %s1887_s7 = sshll.u32 %s2328_s16, 5 }
  0x2a   : > { %s198_s8 = scalar_lea.vmem [#allocation7], %s1745_s4  ;;  %s204_s22 = scalar_lea.hbm %s2778_s2, %s1887_s7 }
  0x2b   : > { %s206_s9 = sshll.u32 %s198_s8, 4  ;;  %p2479_p1 = pnand %p1899_p4, %p79_p5  ;;  %s207_s9 = int_to_ptr.vmem [resolvable:$true] %s206_s9 }
  0x2c   : > { %s2205_s23 = scalar_lea.vmem %s160_s30, 8192  ;;  %p2213_p0 = scmp.lt.s32.totalorder %s160_s30, %s160_s30 }
  0x2d   : > { %p2196_p3 = pneg %p2479_p1  ;;  %p2206_p6 = scmp.ne.s32.totalorder %s160_s30, %s2205_s23 }
  0x2e   : > { %p2214_p8 = scmp.lt.s32.totalorder %s2205_s23, %s2205_s23 }
  0x2f   : > { %p2208_p9 = pnand %p2206_p6, %p2196_p3 }
  0x30   : > { %p2215_p13 = por %p2214_p8, %p2213_p0 }
  0x31   : > { %p2209_p11 = pneg %p2208_p9 }
  0x33   : > { %p2216_p12 = pnand %p2215_p13, %p2209_p11 }
  0x35   : > { %2219 = shalt.err (!%p2216_p12)
}
  0x36   : > { %s2339_s29 = smov 16   ;;  %s2233_s7 = scalar_lea.vmem %s207_s9, 32 }
  0x37   : > { %1902 = dma.hbm_to_vmem [thread:$0]  (!%p2479_p1), %s2776_s0, 8192, %s160_s30, [#allocation3], %s2335_s11, %s2335_s11, %s2339_s29  }
  0x38   : > { %p2234_p4 = scmp.ne.s32.totalorder %s207_s9, %s2233_s7  ;;  %p2789_p3 = pneg %p2426_p7 }
  0x39   : > { %s2340_s19 = smov [#allocation7]  }
  0x3a   : > { %p2236_p6 = pnand %p2234_p4, %p2789_p3  ;;  %s2238_s20 = sshll.u32 %s2340_s19, 4  ;;  %s2239_s20 = int_to_ptr.vmem [resolvable:$false] %s2238_s20 }
  0x3b   : > { %s2240_s23 = scalar_lea.vmem %s2239_s20, 64  ;;  %p2241_p8 = scmp.lt.s32.totalorder %s207_s9, %s2239_s20 }
  0x3c   : > { %p2237_p9 = pneg %p2236_p6  ;;  %p2242_p12 = scmp.lt.s32.totalorder %s2240_s23, %s2233_s7 }
  0x3e   : > { %p2243_p13 = por %p2242_p12, %p2241_p8 }
  0x40   : > { %p2244_p11 = pnand %p2243_p13, %p2237_p9 }
  0x42   : > { %2247 = shalt.err (!%p2244_p11)
}
  0x43   : > { %1909 = dma.hbm_to_vmem [thread:$0]  (!%p2426_p7), %s204_s22, 32, %s207_s9, %s2430_s6  }
  0x44   : > { %215 = sbr.rel (%p2468_p2) target bundleno = 485 (0x1e5), region = 32 }
  0x49   : > { %2299 = dma.done.wait (%p79_p5), [#allocation3], 8192  }
  0x4a   : > { %2301 = vsyncadd (%p79_p5), [#allocation3], 4294959104  ;;  %s221_s11 = sand.u32 1, %s2442_s21   ;;  %s2509_s30 = sand.u32 1, %s2316_s13  }
  0x4b   : > { %s1750_s5 = sshll.u32 %s2509_s30, 9  ;;  %s222_s10 = scalar_lea.sflag [#allocation6], %s221_s11 }
  0x4c   : > { %s2514_s6 = scalar_lea.vmem [#allocation5], %s1750_s5 }
  0x4d   : > { %2303 = dma.done.wait (%p2451_p10), %s222_s10, 8224  }
  0x4e   : > { %2305 = vsyncadd (%p2451_p10), %s222_s10, 4294959072  ;;  %v1974_v0 = vld [vmem:[%s2514_s6 + $0x74] ss:$8 sps:$4 sm:$0xff]   ;;  %v1978_v2 = vld [vmem:[%s2514_s6 + $0x70] ss:$8 sps:$4 sm:$0xff]   ;;  %s1751_s21 = sshll.u32 %s2509_s30, 1 }
  0x4f   : > { %v1976_v1 = vld [vmem:[%s2514_s6 + $0x174] ss:$8 sps:$4 sm:$0xff]   ;;  %1056 = vmatprep.subr.bf16.mxu0 %v1974_v0  ;;  %v1979_v3 = vld [vmem:[%s2514_s6 + $0x170] ss:$8 sps:$4 sm:$0xff]   ;;  %v1980_v4 = vld [vmem:[%s2514_s6 + $0x64] ss:$8 sps:$4 sm:$0xff]  }
  0x50   : > { %1249 = vmatprep.subr.bf16.mxu1 %v1976_v1  ;;  %1057 = vmatpush1.bf16.msra.mxu0 %v1978_v2  ;;  %v1982_v5 = vld [vmem:[%s2514_s6 + $0x164] ss:$8 sps:$4 sm:$0xff]   ;;  %v1984_v6 = vld [vmem:[%s2514_s6 + $0x60] ss:$8 sps:$4 sm:$0xff]   ;;  %v1986_v8 = vld [vmem:[%s2514_s6 + $0x54] ss:$8 sps:$4 sm:$0xff]  }
  0x51   : > { %1250 = vmatpush1.bf16.msra.mxu1 %v1979_v3  ;;  %1058 = vmatprep.subr.bf16.mxu0 %v1980_v4  ;;  %v1985_v7 = vld [vmem:[%s2514_s6 + $0x160] ss:$8 sps:$4 sm:$0xff]   ;;  %v1988_v9 = vld [vmem:[%s2514_s6 + $0x154] ss:$8 sps:$4 sm:$0xff]   ;;  %v1990_v10 = vld [vmem:[%s2514_s6 + $0x50] ss:$8 sps:$4 sm:$0xff]  }
  0x52   : > { %1251 = vmatprep.subr.bf16.mxu1 %v1982_v5  ;;  %v1991_v11 = vld [vmem:[%s2514_s6 + $0x150] ss:$8 sps:$4 sm:$0xff]   ;;  %v1992_v12 = vld [vmem:[%s2514_s6 + $0x44] ss:$8 sps:$4 sm:$0xff]   ;;  %v1996_v14 = vld [vmem:[%s2514_s6 + $0x40] ss:$8 sps:$4 sm:$0xff]  }
  0x53   : > { %v1994_v13 = vld [vmem:[%s2514_s6 + $0x144] ss:$8 sps:$4 sm:$0xff]   ;;  %v1997_v15 = vld [vmem:[%s2514_s6 + $0x140] ss:$8 sps:$4 sm:$0xff]   ;;  %v1998_v16 = vld [vmem:[%s2514_s6 + $0x34] ss:$8 sps:$4 sm:$0xff]  }
  0x54   : > { %1059 = vmatpush1.bf16.msra.mxu0 %v1984_v6  ;;  %v2000_v17 = vld [vmem:[%s2514_s6 + $0x134] ss:$8 sps:$4 sm:$0xff]   ;;  %v2002_v18 = vld [vmem:[%s2514_s6 + $0x30] ss:$8 sps:$4 sm:$0xff]   ;;  %v2004_v20 = vld [vmem:[%s2514_s6 + $0x24] ss:$8 sps:$4 sm:$0xff]  }
  0x55   : > { %1252 = vmatpush1.bf16.msra.mxu1 %v1985_v7  ;;  %1060 = vmatprep.subr.bf16.mxu0 %v1986_v8  ;;  %v2003_v19 = vld [vmem:[%s2514_s6 + $0x130] ss:$8 sps:$4 sm:$0xff]   ;;  %v2006_v21 = vld [vmem:[%s2514_s6 + $0x124] ss:$8 sps:$4 sm:$0xff]   ;;  %v2008_v22 = vld [vmem:[%s2514_s6 + $0x20] ss:$8 sps:$4 sm:$0xff]  }
  0x56   : > { %1253 = vmatprep.subr.bf16.mxu1 %v1988_v9  ;;  %v2009_v23 = vld [vmem:[%s2514_s6 + $0x120] ss:$8 sps:$4 sm:$0xff]   ;;  %v2010_v24 = vld [vmem:[%s2514_s6 + $0x14] ss:$8 sps:$4 sm:$0xff]   ;;  %v2014_v26 = vld [vmem:[%s2514_s6 + $0x10] ss:$8 sps:$4 sm:$0xff]  }
  0x57   : > { %v2012_v25 = vld [vmem:[%s2514_s6 + $0x114] ss:$8 sps:$4 sm:$0xff]   ;;  %v2015_v27 = vld [vmem:[%s2514_s6 + $0x110] ss:$8 sps:$4 sm:$0xff]   ;;  %v2016_v28 = vld [vmem:[%s2514_s6 + $0x4] ss:$8 sps:$4 sm:$0xff]  }
  0x58   : > { %1061 = vmatpush1.bf16.msra.mxu0 %v1990_v10  ;;  %v2018_v29 = vld [vmem:[%s2514_s6 + $0x104] ss:$8 sps:$4 sm:$0xff]   ;;  %v2020_v30 = vld [vmem:[%s2514_s6] ss:$8 sps:$4 sm:$0xff]   ;;  %v2022_v32 = vld [vmem:[%s2514_s6 + $0xf4] ss:$8 sps:$4 sm:$0xff]  }
  0x59   : > { %1254 = vmatpush1.bf16.msra.mxu1 %v1991_v11  ;;  %1062 = vmatprep.subr.bf16.mxu0 %v1992_v12  ;;  %v2021_v31 = vld [vmem:[%s2514_s6 + $0x100] ss:$8 sps:$4 sm:$0xff]   ;;  %v2024_v33 = vld [vmem:[%s2514_s6 + $0x1f4] ss:$8 sps:$4 sm:$0xff]   ;;  %v2026_v34 = vld [vmem:[%s2514_s6 + $0xf0] ss:$8 sps:$4 sm:$0xff]  }
  0x5a   : > { %1255 = vmatprep.subr.bf16.mxu1 %v1994_v13  ;;  %v2027_v35 = vld [vmem:[%s2514_s6 + $0x1f0] ss:$8 sps:$4 sm:$0xff]   ;;  %v2028_v36 = vld [vmem:[%s2514_s6 + $0xe4] ss:$8 sps:$4 sm:$0xff]   ;;  %v2032_v38 = vld [vmem:[%s2514_s6 + $0xe0] ss:$8 sps:$4 sm:$0xff]  }
  0x5b   : > { %v2030_v37 = vld [vmem:[%s2514_s6 + $0x1e4] ss:$8 sps:$4 sm:$0xff]   ;;  %v2033_v39 = vld [vmem:[%s2514_s6 + $0x1e0] ss:$8 sps:$4 sm:$0xff]   ;;  %v2034_v40 = vld [vmem:[%s2514_s6 + $0xd4] ss:$8 sps:$4 sm:$0xff]  }
  0x5c   : > { %1063 = vmatpush1.bf16.msra.mxu0 %v1996_v14  ;;  %v2036_v41 = vld [vmem:[%s2514_s6 + $0x1d4] ss:$8 sps:$4 sm:$0xff]   ;;  %v2038_v42 = vld [vmem:[%s2514_s6 + $0xd0] ss:$8 sps:$4 sm:$0xff]   ;;  %v2040_v44 = vld [vmem:[%s2514_s6 + $0xc4] ss:$8 sps:$4 sm:$0xff]  }
  0x5d   : > { %1256 = vmatpush1.bf16.msra.mxu1 %v1997_v15  ;;  %1064 = vmatprep.subr.bf16.mxu0 %v1998_v16  ;;  %v2039_v43 = vld [vmem:[%s2514_s6 + $0x1d0] ss:$8 sps:$4 sm:$0xff]   ;;  %v2042_v45 = vld [vmem:[%s2514_s6 + $0x1c4] ss:$8 sps:$4 sm:$0xff]   ;;  %v2044_v46 = vld [vmem:[%s2514_s6 + $0xc0] ss:$8 sps:$4 sm:$0xff]  }
  0x5e   : > { %1257 = vmatprep.subr.bf16.mxu1 %v2000_v17  ;;  %v2045_v47 = vld [vmem:[%s2514_s6 + $0x1c0] ss:$8 sps:$4 sm:$0xff]   ;;  %v2046_v48 = vld [vmem:[%s2514_s6 + $0xb4] ss:$8 sps:$4 sm:$0xff]   ;;  %v2050_v52 = vld [vmem:[%s2514_s6 + $0xb0] ss:$8 sps:$4 sm:$0xff]  }
  0x5f   : > { %v2072_v49 = vld [vmem:[#allocation2 + $0x4] ss:$16 sps:$4 sm:$0xff]   ;;  %v2075_v51 = vld [vmem:[#allocation2 + $0xc] ss:$16 sps:$4 sm:$0xff]   ;;  %v2051_v53 = vld [vmem:[%s2514_s6 + $0x1b0] ss:$8 sps:$4 sm:$0xff]  }
  0x60   : > { %1065 = vmatpush1.bf16.msra.mxu0 %v2002_v18  ;;  %v2048_v50 = vld [vmem:[%s2514_s6 + $0x1b4] ss:$8 sps:$4 sm:$0xff]   ;;  %1088 = vmatprep.mubr.bf16.mxu0 %v2072_v49  ;;  %v2052_v54 = vld [vmem:[%s2514_s6 + $0xa4] ss:$8 sps:$4 sm:$0xff]   ;;  %v2056_v56 = vld [vmem:[%s2514_s6 + $0xa0] ss:$8 sps:$4 sm:$0xff]  }
  0x61   : > { %1258 = vmatpush1.bf16.msra.mxu1 %v2003_v19  ;;  %1066 = vmatprep.subr.bf16.mxu0 %v2004_v20  ;;  %v2054_v55 = vld [vmem:[%s2514_s6 + $0x1a4] ss:$8 sps:$4 sm:$0xff]   ;;  %v2057_v57 = vld [vmem:[%s2514_s6 + $0x1a0] ss:$8 sps:$4 sm:$0xff]   ;;  %v2058_v58 = vld [vmem:[%s2514_s6 + $0x94] ss:$8 sps:$4 sm:$0xff]  }
  0x62   : > { %1259 = vmatprep.subr.bf16.mxu1 %v2006_v21  ;;  %1281 = vmatprep.mubr.bf16.mxu1 %v2075_v51  ;;  %v2060_v59 = vld [vmem:[%s2514_s6 + $0x194] ss:$8 sps:$4 sm:$0xff]   ;;  %v2062_v60 = vld [vmem:[%s2514_s6 + $0x90] ss:$8 sps:$4 sm:$0xff]   ;;  %v2064_v62 = vld [vmem:[%s2514_s6 + $0x84] ss:$8 sps:$4 sm:$0xff]  }
  0x63   : > { %v2063_v61 = vld [vmem:[%s2514_s6 + $0x190] ss:$8 sps:$4 sm:$0xff]   ;;  %v2066_v63 = vld [vmem:[%s2514_s6 + $0x184] ss:$8 sps:$4 sm:$0xff]   ;;  %v2068_v0 = vld [vmem:[%s2514_s6 + $0x80] ss:$8 sps:$4 sm:$0xff]  }
  0x64   : > { %1067 = vmatpush1.bf16.msra.mxu0 %v2008_v22  ;;  %v2069_v1 = vld [vmem:[%s2514_s6 + $0x180] ss:$8 sps:$4 sm:$0xff]   ;;  %v2076_v4 = vld [vmem:[#allocation2 + $0x24] ss:$16 sps:$4 sm:$0xff]   ;;  %v2078_v5 = vld [vmem:[#allocation2 + $0x2c] ss:$16 sps:$4 sm:$0xff]  }
  0x65   : > { %1260 = vmatpush1.bf16.msra.mxu1 %v2009_v23  ;;  %1068 = vmatprep.subr.bf16.mxu0 %v2010_v24  ;;  %v2070_v2 = vld [vmem:[#allocation2] ss:$16 sps:$4 sm:$0xff]   ;;  %v2073_v3 = vld [vmem:[#allocation2 + $0x8] ss:$16 sps:$4 sm:$0xff]   ;;  %v2082_v8 = vld [vmem:[#allocation2 + $0x44] ss:$16 sps:$4 sm:$0xff]  }
  0x66   : > { %1261 = vmatprep.subr.bf16.mxu1 %v2012_v25  ;;  %v2080_v6 = vld [vmem:[#allocation2 + $0x20] ss:$16 sps:$4 sm:$0xff]   ;;  %v2081_v7 = vld [vmem:[#allocation2 + $0x28] ss:$16 sps:$4 sm:$0xff]   ;;  %v2084_v9 = vld [vmem:[#allocation2 + $0x4c] ss:$16 sps:$4 sm:$0xff]  }
  0x67   : > { %v2086_v10 = vld [vmem:[#allocation2 + $0x40] ss:$16 sps:$4 sm:$0xff]   ;;  %v2087_v11 = vld [vmem:[#allocation2 + $0x48] ss:$16 sps:$4 sm:$0xff]   ;;  %v2088_v12 = vld [vmem:[#allocation2 + $0x64] ss:$16 sps:$4 sm:$0xff]  }
  0x68   : > { %1069 = vmatpush1.bf16.msra.mxu0 %v2014_v26  ;;  %v2090_v13 = vld [vmem:[#allocation2 + $0x6c] ss:$16 sps:$4 sm:$0xff]   ;;  %v2092_v14 = vld [vmem:[#allocation2 + $0x60] ss:$16 sps:$4 sm:$0xff]   ;;  %v2093_v15 = vld [vmem:[#allocation2 + $0x68] ss:$16 sps:$4 sm:$0xff]  }
  0x69   : > { %1262 = vmatpush1.bf16.msra.mxu1 %v2015_v27  ;;  %1070 = vmatprep.subr.bf16.mxu0 %v2016_v28  ;;  %v2094_v16 = vld [vmem:[#allocation2 + $0x84] ss:$16 sps:$4 sm:$0xff]   ;;  %v2096_v17 = vld [vmem:[#allocation2 + $0x8c] ss:$16 sps:$4 sm:$0xff]   ;;  %v2098_v18 = vld [vmem:[#allocation2 + $0x80] ss:$16 sps:$4 sm:$0xff]  }
  0x6a   : > { %1263 = vmatprep.subr.bf16.mxu1 %v2018_v29  ;;  %v2099_v19 = vld [vmem:[#allocation2 + $0x88] ss:$16 sps:$4 sm:$0xff]   ;;  %v2100_v20 = vld [vmem:[#allocation2 + $0xa4] ss:$16 sps:$4 sm:$0xff]   ;;  %v2102_v21 = vld [vmem:[#allocation2 + $0xac] ss:$16 sps:$4 sm:$0xff]  }
  0x6b   : > { %v2104_v22 = vld [vmem:[#allocation2 + $0xa0] ss:$16 sps:$4 sm:$0xff]   ;;  %v2105_v23 = vld [vmem:[#allocation2 + $0xa8] ss:$16 sps:$4 sm:$0xff]   ;;  %v2106_v24 = vld [vmem:[#allocation2 + $0xc4] ss:$16 sps:$4 sm:$0xff]  }
  0x6c   : > { %1071 = vmatpush1.bf16.msra.mxu0 %v2020_v30  ;;  %v2108_v25 = vld [vmem:[#allocation2 + $0xcc] ss:$16 sps:$4 sm:$0xff]   ;;  %v2110_v26 = vld [vmem:[#allocation2 + $0xc0] ss:$16 sps:$4 sm:$0xff]   ;;  %v2111_v27 = vld [vmem:[#allocation2 + $0xc8] ss:$16 sps:$4 sm:$0xff]  }
  0x6d   : > { %1264 = vmatpush1.bf16.msra.mxu1 %v2021_v31  ;;  %1072 = vmatprep.subr.bf16.mxu0 %v2022_v32  ;;  %v2112_v28 = vld [vmem:[#allocation2 + $0xe4] ss:$16 sps:$4 sm:$0xff]   ;;  %v2114_v29 = vld [vmem:[#allocation2 + $0xec] ss:$16 sps:$4 sm:$0xff]   ;;  %v2116_v30 = vld [vmem:[#allocation2 + $0xe0] ss:$16 sps:$4 sm:$0xff]  }
  0x6e   : > { %1265 = vmatprep.subr.bf16.mxu1 %v2024_v33  ;;  %v2117_v31 = vld [vmem:[#allocation2 + $0xe8] ss:$16 sps:$4 sm:$0xff]   ;;  %v2118_v32 = vld [vmem:[#allocation2 + $0x104] ss:$16 sps:$4 sm:$0xff]   ;;  %v2120_v33 = vld [vmem:[#allocation2 + $0x10c] ss:$16 sps:$4 sm:$0xff]  }
  0x6f   : > { %v2144_v49 = vld [vmem:[#allocation2 + $0x18c] ss:$16 sps:$4 sm:$0xff]   ;;  %v2147_v51 = vld [vmem:[#allocation2 + $0x188] ss:$16 sps:$4 sm:$0xff]   ;;  %s234_s25 = scalar_lea.vmem [#allocation7], %s1751_s21  ;;  %s2596_s28 = scalar_lea.vmem [#allocation8], %s1750_s5 }
  0x70   : > { %1073 = vmatpush2.bf16.msra.mxu0 %v2026_v34  ;;  %v2122_v34 = vld [vmem:[#allocation2 + $0x100] ss:$16 sps:$4 sm:$0xff]   ;;  %s1888_s9 = sshll.u32 %s2324_s15, 8  ;;  %s1619_s22 = sshll.u32 %s2596_s28, 4  ;;  %s2724_s22 = int_to_ptr.vmem [resolvable:$true] %s1619_s22 }
  0x71   : > { %1266 = vmatpush2.bf16.msra.mxu1 %v2027_v35  ;;  %1074 = vmatprep.subr.bf16.mxu0 %v2028_v36  ;;  %v2123_v35 = vld [vmem:[#allocation2 + $0x108] ss:$16 sps:$4 sm:$0xff]   ;;  %v2124_v36 = vld [vmem:[#allocation2 + $0x124] ss:$16 sps:$4 sm:$0xff]   ;;  %s2722_s8 = scalar_lea.hbm %s2779_s3, %s1888_s9  ;;  %s1603_s15 = scalar_lea.sflag [#allocation4], %s2509_s30 }
  0x72   : > { %1267 = vmatprep.subr.bf16.mxu1 %v2030_v37  ;;  %v2126_v37 = vld [vmem:[#allocation2 + $0x12c] ss:$16 sps:$4 sm:$0xff]   ;;  %s2248_s7 = scalar_lea.vmem %s2724_s22, 8192  ;;  %p2790_p5 = scmp.ne.s32.totalorder %s2785_s26, 0 }
  0x73   : > { %p2249_p7 = scmp.ne.s32.totalorder %s2724_s22, %s2248_s7  ;;  %s2341_s19 = smov [#allocation8]  }
  0x74   : > { %1075 = vmatpush2.bf16.msra.mxu0 %v2032_v38  ;;  %v2128_v38 = vld [vmem:[#allocation2 + $0x120] ss:$16 sps:$4 sm:$0xff]   ;;  %s2252_s20 = sshll.u32 %s2341_s19, 4  ;;  %s2253_s20 = int_to_ptr.vmem [resolvable:$false] %s2252_s20 }
  0x75   : > { %1268 = vmatpush2.bf16.msra.mxu1 %v2033_v39  ;;  %1076 = vmatprep.subr.bf16.mxu0 %v2034_v40  ;;  %v2129_v39 = vld [vmem:[#allocation2 + $0x128] ss:$16 sps:$4 sm:$0xff]   ;;  %v2130_v40 = vld [vmem:[#allocation2 + $0x144] ss:$16 sps:$4 sm:$0xff]   ;;  %p2250_p10 = pnand %p2249_p7, %p2790_p5  ;;  %s2254_s23 = scalar_lea.vmem %s2253_s20, 16384 }
  0x76   : > { %1269 = vmatprep.subr.bf16.mxu1 %v2036_v41  ;;  %v2132_v41 = vld [vmem:[#allocation2 + $0x14c] ss:$16 sps:$4 sm:$0xff]   ;;  %p2255_p1 = scmp.lt.s32.totalorder %s2724_s22, %s2253_s20  ;;  %p2256_p0 = scmp.lt.s32.totalorder %s2254_s23, %s2248_s7 }
  0x77   : > { %p2251_p2 = pneg %p2250_p10 }
  0x78   : > { %1077 = vmatpush2.bf16.msra.mxu0 %v2038_v42  ;;  %v2134_v42 = vld [vmem:[#allocation2 + $0x140] ss:$16 sps:$4 sm:$0xff]   ;;  %p2257_p4 = por %p2256_p0, %p2255_p1 }
  0x79   : > { %1270 = vmatpush2.bf16.msra.mxu1 %v2039_v43  ;;  %1078 = vmatprep.subr.bf16.mxu0 %v2040_v44  ;;  %v2135_v43 = vld [vmem:[#allocation2 + $0x148] ss:$16 sps:$4 sm:$0xff]   ;;  %v2136_v44 = vld [vmem:[#allocation2 + $0x164] ss:$16 sps:$4 sm:$0xff]  }
  0x7a   : > { %1271 = vmatprep.subr.bf16.mxu1 %v2042_v45  ;;  %v2138_v45 = vld [vmem:[#allocation2 + $0x16c] ss:$16 sps:$4 sm:$0xff]   ;;  %p2258_p3 = pnand %p2257_p4, %p2251_p2 }
  0x7c   : > { %1079 = vmatpush2.bf16.msra.mxu0 %v2044_v46  ;;  %v2140_v46 = vld [vmem:[#allocation2 + $0x160] ss:$16 sps:$4 sm:$0xff]  }
  0x7d   : > { %1272 = vmatpush2.bf16.msra.mxu1 %v2045_v47  ;;  %1080 = vmatprep.subr.bf16.mxu0 %v2046_v48  ;;  %v2141_v47 = vld [vmem:[#allocation2 + $0x168] ss:$16 sps:$4 sm:$0xff]   ;;  %v2142_v48 = vld [vmem:[#allocation2 + $0x184] ss:$16 sps:$4 sm:$0xff]  }
  0x7e   : > { %1273 = vmatprep.subr.bf16.mxu1 %v2048_v50  ;;  %v2146_v50 = vld [vmem:[#allocation2 + $0x180] ss:$16 sps:$4 sm:$0xff]  }
  0x80   : > { %1081 = vmatpush2.bf16.msra.mxu0 %v2050_v52  ;;  %v2148_v52 = vld [vmem:[#allocation2 + $0x1a4] ss:$16 sps:$4 sm:$0xff]  }
  0x81   : > { %1274 = vmatpush2.bf16.msra.mxu1 %v2051_v53  ;;  %1082 = vmatprep.subr.bf16.mxu0 %v2052_v54  ;;  %v2150_v53 = vld [vmem:[#allocation2 + $0x1ac] ss:$16 sps:$4 sm:$0xff]   ;;  %v2152_v54 = vld [vmem:[#allocation2 + $0x1a0] ss:$16 sps:$4 sm:$0xff]  }
  0x82   : > { %1275 = vmatprep.subr.bf16.mxu1 %v2054_v55  ;;  %v2153_v55 = vld [vmem:[#allocation2 + $0x1a8] ss:$16 sps:$4 sm:$0xff]  }
  0x84   : > { %1083 = vmatpush2.bf16.msra.mxu0 %v2056_v56  ;;  %v2154_v56 = vld [vmem:[#allocation2 + $0x1c4] ss:$16 sps:$4 sm:$0xff]  }
  0x85   : > { %1276 = vmatpush2.bf16.msra.mxu1 %v2057_v57  ;;  %1084 = vmatprep.subr.bf16.mxu0 %v2058_v58  ;;  %v2156_v57 = vld [vmem:[#allocation2 + $0x1cc] ss:$16 sps:$4 sm:$0xff]   ;;  %v2158_v58 = vld [vmem:[#allocation2 + $0x1c0] ss:$16 sps:$4 sm:$0xff]  }
  0x86   : > { %1277 = vmatprep.subr.bf16.mxu1 %v2060_v59  ;;  %v2159_v59 = vld [vmem:[#allocation2 + $0x1c8] ss:$16 sps:$4 sm:$0xff]  }
  0x88   : > { %1085 = vmatpush2.bf16.msra.mxu0 %v2062_v60  ;;  %v2160_v60 = vld [vmem:[#allocation2 + $0x1e4] ss:$16 sps:$4 sm:$0xff]  }
  0x89   : > { %1278 = vmatpush2.bf16.msra.mxu1 %v2063_v61  ;;  %1086 = vmatprep.subr.bf16.mxu0 %v2064_v62  ;;  %v2162_v61 = vld [vmem:[#allocation2 + $0x1ec] ss:$16 sps:$4 sm:$0xff]   ;;  %v2164_v62 = vld [vmem:[#allocation2 + $0x1e0] ss:$16 sps:$4 sm:$0xff]  }
  0x8a   : > { %1279 = vmatprep.subr.bf16.mxu1 %v2066_v63  ;;  %v2165_v63 = vld [vmem:[#allocation2 + $0x1e8] ss:$16 sps:$4 sm:$0xff]  }
  0x8c   : > { %1087 = vmatpush2.bf16.msra.mxu0 %v2068_v0  ;;  %v398_v0 = vlaneseq }
  0x8d   : > { %1280 = vmatpush2.bf16.msra.mxu1 %v2069_v1 }
  0x8e   : > { %v399_v1 = vshrl.u32 %v398_v0, 7 }
  0x8f   : > { %1089 = vmatmul.mubr.bf16.vlgmr.msra.gmra.mxu0 %v2070_v2  ;;  %v395_v2 = vld [vmem:[%s234_s25] sm:$0x3] }
  0x90   : > { %1282 = vmatmul.mubr.bf16.vlgmr.msra.gmra.mxu1 %v2073_v3  ;;  %1098 = vmatprep.mubr.bf16.mxu0 %v2076_v4  ;;  %v396_v3 = vunpack.c.l.bf16 %v395_v2  ;;  %v400_v4 = vsub.s32 0, %v399_v1 }
  0x91   : > { %1291 = vmatprep.mubr.bf16.mxu1 %v2078_v5  ;;  %v404_v5 = vsub.s32 2, %v399_v1 }
  0x97   : > { %1099 = vmatmul.mubr.bf16.gmra.mxu0 %v2080_v6  ;;  %v401_v6 = vrot.slane %v396_v3, %v400_v4 }
  0x98   : > { %1292 = vmatmul.mubr.bf16.gmra.mxu1 %v2081_v7  ;;  %1108 = vmatprep.mubr.bf16.mxu0 %v2082_v8  ;;  %v405_v7 = vrot.slane %v396_v3, %v404_v5 }
  0x99   : > { %1301 = vmatprep.mubr.bf16.mxu1 %v2084_v9  ;;  %v2585_v8 = vrot.slane %v401_v6, %v400_v4 }
  0x9f   : > { %1109 = vmatmul.mubr.bf16.gmra.mxu0 %v2086_v10 }
  0xa0   : > { %1302 = vmatmul.mubr.bf16.gmra.mxu1 %v2087_v11  ;;  %1118 = vmatprep.mubr.bf16.mxu0 %v2088_v12  ;;  %v2587_v11 = vrot.slane %v405_v7, %v400_v4 }
  0xa1   : > { %1311 = vmatprep.mubr.bf16.mxu1 %v2090_v13 }
  0xa7   : > { %1119 = vmatmul.mubr.bf16.gmra.mxu0 %v2092_v14 }
  0xa8   : > { %1312 = vmatmul.mubr.bf16.gmra.mxu1 %v2093_v15  ;;  %1128 = vmatprep.mubr.bf16.mxu0 %v2094_v16 }
  0xa9   : > { %1321 = vmatprep.mubr.bf16.mxu1 %v2096_v17 }
  0xaf   : > { %1129 = vmatmul.mubr.bf16.gmra.mxu0 %v2098_v18 }
  0xb0   : > { %1322 = vmatmul.mubr.bf16.gmra.mxu1 %v2099_v19  ;;  %1138 = vmatprep.mubr.bf16.mxu0 %v2100_v20 }
  0xb1   : > { %1331 = vmatprep.mubr.bf16.mxu1 %v2102_v21 }
  0xb7   : > { %1139 = vmatmul.mubr.bf16.gmra.mxu0 %v2104_v22 }
  0xb8   : > { %1332 = vmatmul.mubr.bf16.gmra.mxu1 %v2105_v23  ;;  %1148 = vmatprep.mubr.bf16.mxu0 %v2106_v24 }
  0xb9   : > { %1341 = vmatprep.mubr.bf16.mxu1 %v2108_v25 }
  0xbf   : > { %1149 = vmatmul.mubr.bf16.gmra.mxu0 %v2110_v26 }
  0xc0   : > { %1342 = vmatmul.mubr.bf16.gmra.mxu1 %v2111_v27  ;;  %1158 = vmatprep.mubr.bf16.mxu0 %v2112_v28 }
  0xc1   : > { %1351 = vmatprep.mubr.bf16.mxu1 %v2114_v29 }
  0xc7   : > { %1159 = vmatmul.mubr.bf16.gmra.mxu0 %v2116_v30 }
  0xc8   : > { %1352 = vmatmul.mubr.bf16.gmra.mxu1 %v2117_v31  ;;  %1168 = vmatprep.mubr.bf16.mxu0 %v2118_v32 }
  0xc9   : > { %1361 = vmatprep.mubr.bf16.mxu1 %v2120_v33 }
  0xcf   : > { %1169 = vmatmul.mubr.bf16.gmra.mxu0 %v2122_v34 }
  0xd0   : > { %1362 = vmatmul.mubr.bf16.gmra.mxu1 %v2123_v35  ;;  %1178 = vmatprep.mubr.bf16.mxu0 %v2124_v36 }
  0xd1   : > { %1371 = vmatprep.mubr.bf16.mxu1 %v2126_v37 }
  0xd7   : > { %1179 = vmatmul.mubr.bf16.gmra.mxu0 %v2128_v38 }
  0xd8   : > { %1372 = vmatmul.mubr.bf16.gmra.mxu1 %v2129_v39  ;;  %1188 = vmatprep.mubr.bf16.mxu0 %v2130_v40 }
  0xd9   : > { %1381 = vmatprep.mubr.bf16.mxu1 %v2132_v41 }
  0xdf   : > { %1189 = vmatmul.mubr.bf16.gmra.mxu0 %v2134_v42 }
  0xe0   : > { %1382 = vmatmul.mubr.bf16.gmra.mxu1 %v2135_v43  ;;  %1198 = vmatprep.mubr.bf16.mxu0 %v2136_v44 }
  0xe1   : > { %1391 = vmatprep.mubr.bf16.mxu1 %v2138_v45 }
  0xe7   : > { %1199 = vmatmul.mubr.bf16.gmra.mxu0 %v2140_v46 }
  0xe8   : > { %1392 = vmatmul.mubr.bf16.gmra.mxu1 %v2141_v47  ;;  %1208 = vmatprep.mubr.bf16.mxu0 %v2142_v48 }
  0xe9   : > { %1401 = vmatprep.mubr.bf16.mxu1 %v2144_v49 }
  0xef   : > { %1209 = vmatmul.mubr.bf16.gmra.mxu0 %v2146_v50 }
  0xf0   : > { %1402 = vmatmul.mubr.bf16.gmra.mxu1 %v2147_v51  ;;  %1218 = vmatprep.mubr.bf16.mxu0 %v2148_v52 }
  0xf1   : > { %1411 = vmatprep.mubr.bf16.mxu1 %v2150_v53 }
  0xf7   : > { %1219 = vmatmul.mubr.bf16.gmra.mxu0 %v2152_v54 }
  0xf8   : > { %1412 = vmatmul.mubr.bf16.gmra.mxu1 %v2153_v55  ;;  %1228 = vmatprep.mubr.bf16.mxu0 %v2154_v56 }
  0xf9   : > { %1421 = vmatprep.mubr.bf16.mxu1 %v2156_v57 }
  0xff   : > { %1229 = vmatmul.mubr.bf16.gmra.mxu0 %v2158_v58 }
 0x100   : > { %1422 = vmatmul.mubr.bf16.gmra.mxu1 %v2159_v59  ;;  %1238 = vmatprep.mubr.bf16.mxu0 %v2160_v60 }
 0x101   : > { %1431 = vmatprep.mubr.bf16.mxu1 %v2162_v61 }
 0x107   : > { %1239 = vmatmul.mubr.bf16.gmra.mxu0 %v2164_v62 }
 0x108   : > { %1432 = vmatmul.mubr.bf16.gmra.mxu1 %v2165_v63 }
 0x14f   : > { %v1090_v9 = vpop.f32.mrf.mxu0 }
 0x150   : > { %v1283_v10 = vpop.f32.mrf.mxu1  ;;  %v1091_v14 = vadd.f32 %v1090_v9, %v2585_v8 }
 0x151   : > { %v1092_v12 = vpop.f32.mrf.mxu0 }
 0x152   : > { %v1285_v13 = vpop.f32.mrf.mxu1  ;;  %v1093_v17 = vadd.f32 %v1092_v12, %v2587_v11  ;;  %v1284_v21 = vadd.f32 %v1283_v10, %v1091_v14 }
 0x153   : > { %v1094_v15 = vpop.f32.mrf.mxu0 }
 0x154   : > { %v1287_v16 = vpop.f32.mrf.mxu1  ;;  %v1095_v18 = vadd.f32 %v1094_v15, %v2585_v8  ;;  %v1286_v26 = vadd.f32 %v1285_v13, %v1093_v17 }
 0x155   : > { %v1096_v19 = vpop.f32.mrf.mxu0 }
 0x156   : > { %v1289_v20 = vpop.f32.mrf.mxu1  ;;  %v1288_v22 = vadd.f32 %v1287_v16, %v1095_v18  ;;  %v1097_v23 = vadd.f32 %v1096_v19, %v2587_v11 }
 0x157   : > { %v1100_v24 = vpop.f32.mrf.mxu0 }
 0x158   : > { %v1293_v25 = vpop.f32.mrf.mxu1  ;;  %v1442_v27 = vpack.c.bf16 %v1288_v22, %v1284_v21  ;;  %v1290_v28 = vadd.f32 %v1289_v20, %v1097_v23  ;;  %v1101_v34 = vadd.f32 %v1100_v24, %v2585_v8 }
 0x159   : > { %v1102_v29 = vpop.f32.mrf.mxu0 }
 0x15a   : > { %v1295_v30 = vpop.f32.mrf.mxu1  ;;  %v1474_v31 = vunpack.c.l.bf16 %v1442_v27  ;;  %v1476_v32 = vunpack.c.h.bf16 %v1442_v27  ;;  %v1443_v33 = vpack.c.bf16 %v1290_v28, %v1286_v26  ;;  %v1103_v39 = vadd.f32 %v1102_v29, %v2587_v11 }
 0x15b   : > { %v1104_v35 = vpop.f32.mrf.mxu0  ;;  %v1294_v43 = vadd.f32 %v1293_v25, %v1101_v34 }
 0x15c   : > { %v1297_v36 = vpop.f32.mrf.mxu1  ;;  %1538 = vst [vmem:[%s2596_s28] sm:$0xff] %v1474_v31  ;;  %1540 = vst [vmem:[%s2596_s28 + $0x10] sm:$0xff] %v1476_v32  ;;  %v1475_v37 = vunpack.c.l.bf16 %v1443_v33  ;;  %v1477_v38 = vunpack.c.h.bf16 %v1443_v33  ;;  %v1105_v40 = vadd.f32 %v1104_v35, %v2585_v8  ;;  %v1296_v48 = vadd.f32 %v1295_v30, %v1103_v39 }
 0x15d   : > { %v1106_v41 = vpop.f32.mrf.mxu0 }
 0x15e   : > { %v1299_v42 = vpop.f32.mrf.mxu1  ;;  %1539 = vst [vmem:[%s2596_s28 + $0x8] sm:$0xff] %v1475_v37  ;;  %1541 = vst [vmem:[%s2596_s28 + $0x18] sm:$0xff] %v1477_v38  ;;  %v1298_v44 = vadd.f32 %v1297_v36, %v1105_v40  ;;  %v1107_v45 = vadd.f32 %v1106_v41, %v2587_v11 }
 0x15f   : > { %v1110_v46 = vpop.f32.mrf.mxu0 }
 0x160   : > { %v1303_v47 = vpop.f32.mrf.mxu1  ;;  %v1444_v49 = vpack.c.bf16 %v1298_v44, %v1294_v43  ;;  %v1300_v50 = vadd.f32 %v1299_v42, %v1107_v45  ;;  %v1111_v56 = vadd.f32 %v1110_v46, %v2585_v8 }
 0x161   : > { %v1112_v51 = vpop.f32.mrf.mxu0 }
 0x162   : > { %v1305_v52 = vpop.f32.mrf.mxu1  ;;  %v1478_v53 = vunpack.c.l.bf16 %v1444_v49  ;;  %v1480_v54 = vunpack.c.h.bf16 %v1444_v49  ;;  %v1445_v55 = vpack.c.bf16 %v1300_v50, %v1296_v48  ;;  %v1113_v61 = vadd.f32 %v1112_v51, %v2587_v11 }
 0x163   : > { %v1114_v57 = vpop.f32.mrf.mxu0  ;;  %v1304_v1 = vadd.f32 %v1303_v47, %v1111_v56 }
 0x164   : > { %v1307_v58 = vpop.f32.mrf.mxu1  ;;  %1542 = vst [vmem:[%s2596_s28 + $0x20] sm:$0xff] %v1478_v53  ;;  %1544 = vst [vmem:[%s2596_s28 + $0x30] sm:$0xff] %v1480_v54  ;;  %v1479_v59 = vunpack.c.l.bf16 %v1445_v55  ;;  %v1481_v60 = vunpack.c.h.bf16 %v1445_v55  ;;  %v1115_v62 = vadd.f32 %v1114_v57, %v2585_v8  ;;  %v1306_v6 = vadd.f32 %v1305_v52, %v1113_v61 }
 0x165   : > { %v1116_v63 = vpop.f32.mrf.mxu0 }
 0x166   : > { %v1309_v0 = vpop.f32.mrf.mxu1  ;;  %1543 = vst [vmem:[%s2596_s28 + $0x28] sm:$0xff] %v1479_v59  ;;  %1545 = vst [vmem:[%s2596_s28 + $0x38] sm:$0xff] %v1481_v60  ;;  %v1308_v2 = vadd.f32 %v1307_v58, %v1115_v62  ;;  %v1117_v3 = vadd.f32 %v1116_v63, %v2587_v11 }
 0x167   : > { %v1120_v4 = vpop.f32.mrf.mxu0 }
 0x168   : > { %v1313_v5 = vpop.f32.mrf.mxu1  ;;  %v1446_v7 = vpack.c.bf16 %v1308_v2, %v1304_v1  ;;  %v1310_v9 = vadd.f32 %v1309_v0, %v1117_v3  ;;  %v1121_v16 = vadd.f32 %v1120_v4, %v2585_v8 }
 0x169   : > { %v1122_v10 = vpop.f32.mrf.mxu0 }
 0x16a   : > { %v1315_v12 = vpop.f32.mrf.mxu1  ;;  %v1482_v13 = vunpack.c.l.bf16 %v1446_v7  ;;  %v1484_v14 = vunpack.c.h.bf16 %v1446_v7  ;;  %v1447_v15 = vpack.c.bf16 %v1310_v9, %v1306_v6  ;;  %v1123_v21 = vadd.f32 %v1122_v10, %v2587_v11 }
 0x16b   : > { %v1124_v17 = vpop.f32.mrf.mxu0  ;;  %v1314_v25 = vadd.f32 %v1313_v5, %v1121_v16 }
 0x16c   : > { %v1317_v18 = vpop.f32.mrf.mxu1  ;;  %1546 = vst [vmem:[%s2596_s28 + $0x40] sm:$0xff] %v1482_v13  ;;  %1548 = vst [vmem:[%s2596_s28 + $0x50] sm:$0xff] %v1484_v14  ;;  %v1483_v19 = vunpack.c.l.bf16 %v1447_v15  ;;  %v1485_v20 = vunpack.c.h.bf16 %v1447_v15  ;;  %v1125_v22 = vadd.f32 %v1124_v17, %v2585_v8  ;;  %v1316_v30 = vadd.f32 %v1315_v12, %v1123_v21 }
 0x16d   : > { %v1126_v23 = vpop.f32.mrf.mxu0 }
 0x16e   : > { %v1319_v24 = vpop.f32.mrf.mxu1  ;;  %1547 = vst [vmem:[%s2596_s28 + $0x48] sm:$0xff] %v1483_v19  ;;  %1549 = vst [vmem:[%s2596_s28 + $0x58] sm:$0xff] %v1485_v20  ;;  %v1318_v26 = vadd.f32 %v1317_v18, %v1125_v22  ;;  %v1127_v27 = vadd.f32 %v1126_v23, %v2587_v11 }
 0x16f   : > { %v1130_v28 = vpop.f32.mrf.mxu0 }
 0x170   : > { %v1323_v29 = vpop.f32.mrf.mxu1  ;;  %v1448_v31 = vpack.c.bf16 %v1318_v26, %v1314_v25  ;;  %v1320_v32 = vadd.f32 %v1319_v24, %v1127_v27  ;;  %v1131_v38 = vadd.f32 %v1130_v28, %v2585_v8 }
 0x171   : > { %v1132_v33 = vpop.f32.mrf.mxu0 }
 0x172   : > { %v1325_v34 = vpop.f32.mrf.mxu1  ;;  %v1486_v35 = vunpack.c.l.bf16 %v1448_v31  ;;  %v1488_v36 = vunpack.c.h.bf16 %v1448_v31  ;;  %v1449_v37 = vpack.c.bf16 %v1320_v32, %v1316_v30  ;;  %v1133_v43 = vadd.f32 %v1132_v33, %v2587_v11 }
 0x173   : > { %v1134_v39 = vpop.f32.mrf.mxu0  ;;  %v1324_v47 = vadd.f32 %v1323_v29, %v1131_v38 }
 0x174   : > { %v1327_v40 = vpop.f32.mrf.mxu1  ;;  %1550 = vst [vmem:[%s2596_s28 + $0x60] sm:$0xff] %v1486_v35  ;;  %1552 = vst [vmem:[%s2596_s28 + $0x70] sm:$0xff] %v1488_v36  ;;  %v1487_v41 = vunpack.c.l.bf16 %v1449_v37  ;;  %v1489_v42 = vunpack.c.h.bf16 %v1449_v37  ;;  %v1135_v44 = vadd.f32 %v1134_v39, %v2585_v8  ;;  %v1326_v52 = vadd.f32 %v1325_v34, %v1133_v43 }
 0x175   : > { %v1136_v45 = vpop.f32.mrf.mxu0 }
 0x176   : > { %v1329_v46 = vpop.f32.mrf.mxu1  ;;  %1551 = vst [vmem:[%s2596_s28 + $0x68] sm:$0xff] %v1487_v41  ;;  %1553 = vst [vmem:[%s2596_s28 + $0x78] sm:$0xff] %v1489_v42  ;;  %v1328_v48 = vadd.f32 %v1327_v40, %v1135_v44  ;;  %v1137_v49 = vadd.f32 %v1136_v45, %v2587_v11 }
 0x177   : > { %v1140_v50 = vpop.f32.mrf.mxu0 }
 0x178   : > { %v1333_v51 = vpop.f32.mrf.mxu1  ;;  %v1450_v53 = vpack.c.bf16 %v1328_v48, %v1324_v47  ;;  %v1330_v54 = vadd.f32 %v1329_v46, %v1137_v49  ;;  %v1141_v60 = vadd.f32 %v1140_v50, %v2585_v8 }
 0x179   : > { %v1142_v55 = vpop.f32.mrf.mxu0 }
 0x17a   : > { %v1335_v56 = vpop.f32.mrf.mxu1  ;;  %v1490_v57 = vunpack.c.l.bf16 %v1450_v53  ;;  %v1492_v58 = vunpack.c.h.bf16 %v1450_v53  ;;  %v1451_v59 = vpack.c.bf16 %v1330_v54, %v1326_v52  ;;  %v1143_v1 = vadd.f32 %v1142_v55, %v2587_v11 }
 0x17b   : > { %v1144_v61 = vpop.f32.mrf.mxu0  ;;  %v1334_v5 = vadd.f32 %v1333_v51, %v1141_v60 }
 0x17c   : > { %v1337_v62 = vpop.f32.mrf.mxu1  ;;  %1554 = vst [vmem:[%s2596_s28 + $0x80] sm:$0xff] %v1490_v57  ;;  %1556 = vst [vmem:[%s2596_s28 + $0x90] sm:$0xff] %v1492_v58  ;;  %v1491_v63 = vunpack.c.l.bf16 %v1451_v59  ;;  %v1493_v0 = vunpack.c.h.bf16 %v1451_v59  ;;  %v1145_v2 = vadd.f32 %v1144_v61, %v2585_v8  ;;  %v1336_v12 = vadd.f32 %v1335_v56, %v1143_v1 }
 0x17d   : > { %v1146_v3 = vpop.f32.mrf.mxu0 }
 0x17e   : > { %v1339_v4 = vpop.f32.mrf.mxu1  ;;  %1555 = vst [vmem:[%s2596_s28 + $0x88] sm:$0xff] %v1491_v63  ;;  %1557 = vst [vmem:[%s2596_s28 + $0x98] sm:$0xff] %v1493_v0  ;;  %v1338_v6 = vadd.f32 %v1337_v62, %v1145_v2  ;;  %v1147_v7 = vadd.f32 %v1146_v3, %v2587_v11 }
 0x17f   : > { %v1150_v9 = vpop.f32.mrf.mxu0 }
 0x180   : > { %v1343_v10 = vpop.f32.mrf.mxu1  ;;  %v1452_v13 = vpack.c.bf16 %v1338_v6, %v1334_v5  ;;  %v1340_v14 = vadd.f32 %v1339_v4, %v1147_v7  ;;  %v1151_v20 = vadd.f32 %v1150_v9, %v2585_v8 }
 0x181   : > { %v1152_v15 = vpop.f32.mrf.mxu0 }
 0x182   : > { %v1345_v16 = vpop.f32.mrf.mxu1  ;;  %v1494_v17 = vunpack.c.l.bf16 %v1452_v13  ;;  %v1496_v18 = vunpack.c.h.bf16 %v1452_v13  ;;  %v1453_v19 = vpack.c.bf16 %v1340_v14, %v1336_v12  ;;  %v1153_v25 = vadd.f32 %v1152_v15, %v2587_v11 }
 0x183   : > { %v1154_v21 = vpop.f32.mrf.mxu0  ;;  %v1344_v29 = vadd.f32 %v1343_v10, %v1151_v20 }
 0x184   : > { %v1347_v22 = vpop.f32.mrf.mxu1  ;;  %1558 = vst [vmem:[%s2596_s28 + $0xa0] sm:$0xff] %v1494_v17  ;;  %1560 = vst [vmem:[%s2596_s28 + $0xb0] sm:$0xff] %v1496_v18  ;;  %v1495_v23 = vunpack.c.l.bf16 %v1453_v19  ;;  %v1497_v24 = vunpack.c.h.bf16 %v1453_v19  ;;  %v1155_v26 = vadd.f32 %v1154_v21, %v2585_v8  ;;  %v1346_v34 = vadd.f32 %v1345_v16, %v1153_v25 }
 0x185   : > { %v1156_v27 = vpop.f32.mrf.mxu0 }
 0x186   : > { %v1349_v28 = vpop.f32.mrf.mxu1  ;;  %1559 = vst [vmem:[%s2596_s28 + $0xa8] sm:$0xff] %v1495_v23  ;;  %1561 = vst [vmem:[%s2596_s28 + $0xb8] sm:$0xff] %v1497_v24  ;;  %v1348_v30 = vadd.f32 %v1347_v22, %v1155_v26  ;;  %v1157_v31 = vadd.f32 %v1156_v27, %v2587_v11 }
 0x187   : > { %v1160_v32 = vpop.f32.mrf.mxu0 }
 0x188   : > { %v1353_v33 = vpop.f32.mrf.mxu1  ;;  %v1454_v35 = vpack.c.bf16 %v1348_v30, %v1344_v29  ;;  %v1350_v36 = vadd.f32 %v1349_v28, %v1157_v31  ;;  %v1161_v42 = vadd.f32 %v1160_v32, %v2585_v8 }
 0x189   : > { %v1162_v37 = vpop.f32.mrf.mxu0 }
 0x18a   : > { %v1355_v38 = vpop.f32.mrf.mxu1  ;;  %v1498_v39 = vunpack.c.l.bf16 %v1454_v35  ;;  %v1500_v40 = vunpack.c.h.bf16 %v1454_v35  ;;  %v1455_v41 = vpack.c.bf16 %v1350_v36, %v1346_v34  ;;  %v1163_v47 = vadd.f32 %v1162_v37, %v2587_v11 }
 0x18b   : > { %v1164_v43 = vpop.f32.mrf.mxu0  ;;  %v1354_v51 = vadd.f32 %v1353_v33, %v1161_v42 }
 0x18c   : > { %v1357_v44 = vpop.f32.mrf.mxu1  ;;  %1562 = vst [vmem:[%s2596_s28 + $0xc0] sm:$0xff] %v1498_v39  ;;  %1564 = vst [vmem:[%s2596_s28 + $0xd0] sm:$0xff] %v1500_v40  ;;  %v1499_v45 = vunpack.c.l.bf16 %v1455_v41  ;;  %v1501_v46 = vunpack.c.h.bf16 %v1455_v41  ;;  %v1165_v48 = vadd.f32 %v1164_v43, %v2585_v8  ;;  %v1356_v56 = vadd.f32 %v1355_v38, %v1163_v47 }
 0x18d   : > { %v1166_v49 = vpop.f32.mrf.mxu0 }
 0x18e   : > { %v1359_v50 = vpop.f32.mrf.mxu1  ;;  %1563 = vst [vmem:[%s2596_s28 + $0xc8] sm:$0xff] %v1499_v45  ;;  %1565 = vst [vmem:[%s2596_s28 + $0xd8] sm:$0xff] %v1501_v46  ;;  %v1358_v52 = vadd.f32 %v1357_v44, %v1165_v48  ;;  %v1167_v53 = vadd.f32 %v1166_v49, %v2587_v11 }
 0x18f   : > { %v1170_v54 = vpop.f32.mrf.mxu0 }
 0x190   : > { %v1363_v55 = vpop.f32.mrf.mxu1  ;;  %v1456_v57 = vpack.c.bf16 %v1358_v52, %v1354_v51  ;;  %v1360_v58 = vadd.f32 %v1359_v50, %v1167_v53  ;;  %v1171_v0 = vadd.f32 %v1170_v54, %v2585_v8 }
 0x191   : > { %v1172_v59 = vpop.f32.mrf.mxu0 }
 0x192   : > { %v1365_v60 = vpop.f32.mrf.mxu1  ;;  %v1502_v61 = vunpack.c.l.bf16 %v1456_v57  ;;  %v1504_v62 = vunpack.c.h.bf16 %v1456_v57  ;;  %v1457_v63 = vpack.c.bf16 %v1360_v58, %v1356_v56  ;;  %v1173_v5 = vadd.f32 %v1172_v59, %v2587_v11 }
 0x193   : > { %v1174_v1 = vpop.f32.mrf.mxu0  ;;  %v1364_v10 = vadd.f32 %v1363_v55, %v1171_v0 }
 0x194   : > { %v1367_v2 = vpop.f32.mrf.mxu1  ;;  %1566 = vst [vmem:[%s2596_s28 + $0xe0] sm:$0xff] %v1502_v61  ;;  %1568 = vst [vmem:[%s2596_s28 + $0xf0] sm:$0xff] %v1504_v62  ;;  %v1503_v3 = vunpack.c.l.bf16 %v1457_v63  ;;  %v1505_v4 = vunpack.c.h.bf16 %v1457_v63  ;;  %v1175_v6 = vadd.f32 %v1174_v1, %v2585_v8  ;;  %v1366_v16 = vadd.f32 %v1365_v60, %v1173_v5 }
 0x195   : > { %v1176_v7 = vpop.f32.mrf.mxu0 }
 0x196   : > { %v1369_v9 = vpop.f32.mrf.mxu1  ;;  %1567 = vst [vmem:[%s2596_s28 + $0xe8] sm:$0xff] %v1503_v3  ;;  %1569 = vst [vmem:[%s2596_s28 + $0xf8] sm:$0xff] %v1505_v4  ;;  %v1368_v12 = vadd.f32 %v1367_v2, %v1175_v6  ;;  %v1177_v13 = vadd.f32 %v1176_v7, %v2587_v11 }
 0x197   : > { %v1180_v14 = vpop.f32.mrf.mxu0 }
 0x198   : > { %v1373_v15 = vpop.f32.mrf.mxu1  ;;  %v1458_v17 = vpack.c.bf16 %v1368_v12, %v1364_v10  ;;  %v1370_v18 = vadd.f32 %v1369_v9, %v1177_v13  ;;  %v1181_v24 = vadd.f32 %v1180_v14, %v2585_v8 }
 0x199   : > { %v1182_v19 = vpop.f32.mrf.mxu0 }
 0x19a   : > { %v1375_v20 = vpop.f32.mrf.mxu1  ;;  %v1506_v21 = vunpack.c.l.bf16 %v1458_v17  ;;  %v1508_v22 = vunpack.c.h.bf16 %v1458_v17  ;;  %v1459_v23 = vpack.c.bf16 %v1370_v18, %v1366_v16  ;;  %v1183_v29 = vadd.f32 %v1182_v19, %v2587_v11 }
 0x19b   : > { %v1184_v25 = vpop.f32.mrf.mxu0  ;;  %v1374_v33 = vadd.f32 %v1373_v15, %v1181_v24 }
 0x19c   : > { %v1377_v26 = vpop.f32.mrf.mxu1  ;;  %1570 = vst [vmem:[%s2596_s28 + $0x100] sm:$0xff] %v1506_v21  ;;  %1572 = vst [vmem:[%s2596_s28 + $0x110] sm:$0xff] %v1508_v22  ;;  %v1507_v27 = vunpack.c.l.bf16 %v1459_v23  ;;  %v1509_v28 = vunpack.c.h.bf16 %v1459_v23  ;;  %v1185_v30 = vadd.f32 %v1184_v25, %v2585_v8  ;;  %v1376_v38 = vadd.f32 %v1375_v20, %v1183_v29 }
 0x19d   : > { %v1186_v31 = vpop.f32.mrf.mxu0 }
 0x19e   : > { %v1379_v32 = vpop.f32.mrf.mxu1  ;;  %1571 = vst [vmem:[%s2596_s28 + $0x108] sm:$0xff] %v1507_v27  ;;  %1573 = vst [vmem:[%s2596_s28 + $0x118] sm:$0xff] %v1509_v28  ;;  %v1378_v34 = vadd.f32 %v1377_v26, %v1185_v30  ;;  %v1187_v35 = vadd.f32 %v1186_v31, %v2587_v11 }
 0x19f   : > { %v1190_v36 = vpop.f32.mrf.mxu0 }
 0x1a0   : > { %v1383_v37 = vpop.f32.mrf.mxu1  ;;  %v1460_v39 = vpack.c.bf16 %v1378_v34, %v1374_v33  ;;  %v1380_v40 = vadd.f32 %v1379_v32, %v1187_v35  ;;  %v1191_v46 = vadd.f32 %v1190_v36, %v2585_v8 }
 0x1a1   : > { %v1192_v41 = vpop.f32.mrf.mxu0 }
 0x1a2   : > { %v1385_v42 = vpop.f32.mrf.mxu1  ;;  %v1510_v43 = vunpack.c.l.bf16 %v1460_v39  ;;  %v1512_v44 = vunpack.c.h.bf16 %v1460_v39  ;;  %v1461_v45 = vpack.c.bf16 %v1380_v40, %v1376_v38  ;;  %v1193_v51 = vadd.f32 %v1192_v41, %v2587_v11 }
 0x1a3   : > { %v1194_v47 = vpop.f32.mrf.mxu0  ;;  %v1384_v55 = vadd.f32 %v1383_v37, %v1191_v46 }
 0x1a4   : > { %v1387_v48 = vpop.f32.mrf.mxu1  ;;  %1574 = vst [vmem:[%s2596_s28 + $0x120] sm:$0xff] %v1510_v43  ;;  %1576 = vst [vmem:[%s2596_s28 + $0x130] sm:$0xff] %v1512_v44  ;;  %v1511_v49 = vunpack.c.l.bf16 %v1461_v45  ;;  %v1513_v50 = vunpack.c.h.bf16 %v1461_v45  ;;  %v1195_v52 = vadd.f32 %v1194_v47, %v2585_v8  ;;  %v1386_v60 = vadd.f32 %v1385_v42, %v1193_v51 }
 0x1a5   : > { %v1196_v53 = vpop.f32.mrf.mxu0 }
 0x1a6   : > { %v1389_v54 = vpop.f32.mrf.mxu1  ;;  %1575 = vst [vmem:[%s2596_s28 + $0x128] sm:$0xff] %v1511_v49  ;;  %1577 = vst [vmem:[%s2596_s28 + $0x138] sm:$0xff] %v1513_v50  ;;  %v1388_v56 = vadd.f32 %v1387_v48, %v1195_v52  ;;  %v1197_v57 = vadd.f32 %v1196_v53, %v2587_v11 }
 0x1a7   : > { %v1200_v58 = vpop.f32.mrf.mxu0 }
 0x1a8   : > { %v1393_v59 = vpop.f32.mrf.mxu1  ;;  %v1462_v61 = vpack.c.bf16 %v1388_v56, %v1384_v55  ;;  %v1390_v62 = vadd.f32 %v1389_v54, %v1197_v57  ;;  %v1201_v4 = vadd.f32 %v1200_v58, %v2585_v8 }
 0x1a9   : > { %v1202_v63 = vpop.f32.mrf.mxu0 }
 0x1aa   : > { %v1395_v0 = vpop.f32.mrf.mxu1  ;;  %v1514_v1 = vunpack.c.l.bf16 %v1462_v61  ;;  %v1516_v2 = vunpack.c.h.bf16 %v1462_v61  ;;  %v1463_v3 = vpack.c.bf16 %v1390_v62, %v1386_v60  ;;  %v1203_v10 = vadd.f32 %v1202_v63, %v2587_v11 }
 0x1ab   : > { %v1204_v5 = vpop.f32.mrf.mxu0  ;;  %v1394_v15 = vadd.f32 %v1393_v59, %v1201_v4 }
 0x1ac   : > { %v1397_v6 = vpop.f32.mrf.mxu1  ;;  %1578 = vst [vmem:[%s2596_s28 + $0x140] sm:$0xff] %v1514_v1  ;;  %1580 = vst [vmem:[%s2596_s28 + $0x150] sm:$0xff] %v1516_v2  ;;  %v1515_v7 = vunpack.c.l.bf16 %v1463_v3  ;;  %v1517_v9 = vunpack.c.h.bf16 %v1463_v3  ;;  %v1205_v12 = vadd.f32 %v1204_v5, %v2585_v8  ;;  %v1396_v20 = vadd.f32 %v1395_v0, %v1203_v10 }
 0x1ad   : > { %v1206_v13 = vpop.f32.mrf.mxu0 }
 0x1ae   : > { %v1399_v14 = vpop.f32.mrf.mxu1  ;;  %1579 = vst [vmem:[%s2596_s28 + $0x148] sm:$0xff] %v1515_v7  ;;  %1581 = vst [vmem:[%s2596_s28 + $0x158] sm:$0xff] %v1517_v9  ;;  %v1398_v16 = vadd.f32 %v1397_v6, %v1205_v12  ;;  %v1207_v17 = vadd.f32 %v1206_v13, %v2587_v11 }
 0x1af   : > { %v1210_v18 = vpop.f32.mrf.mxu0 }
 0x1b0   : > { %v1403_v19 = vpop.f32.mrf.mxu1  ;;  %v1464_v21 = vpack.c.bf16 %v1398_v16, %v1394_v15  ;;  %v1400_v22 = vadd.f32 %v1399_v14, %v1207_v17  ;;  %v1211_v28 = vadd.f32 %v1210_v18, %v2585_v8 }
 0x1b1   : > { %v1212_v23 = vpop.f32.mrf.mxu0 }
 0x1b2   : > { %v1405_v24 = vpop.f32.mrf.mxu1  ;;  %v1518_v25 = vunpack.c.l.bf16 %v1464_v21  ;;  %v1520_v26 = vunpack.c.h.bf16 %v1464_v21  ;;  %v1465_v27 = vpack.c.bf16 %v1400_v22, %v1396_v20  ;;  %v1213_v33 = vadd.f32 %v1212_v23, %v2587_v11 }
 0x1b3   : > { %v1214_v29 = vpop.f32.mrf.mxu0  ;;  %v1404_v37 = vadd.f32 %v1403_v19, %v1211_v28 }
 0x1b4   : > { %v1407_v30 = vpop.f32.mrf.mxu1  ;;  %1582 = vst [vmem:[%s2596_s28 + $0x160] sm:$0xff] %v1518_v25  ;;  %1584 = vst [vmem:[%s2596_s28 + $0x170] sm:$0xff] %v1520_v26  ;;  %v1519_v31 = vunpack.c.l.bf16 %v1465_v27  ;;  %v1521_v32 = vunpack.c.h.bf16 %v1465_v27  ;;  %v1215_v34 = vadd.f32 %v1214_v29, %v2585_v8  ;;  %v1406_v42 = vadd.f32 %v1405_v24, %v1213_v33 }
 0x1b5   : > { %v1216_v35 = vpop.f32.mrf.mxu0 }
 0x1b6   : > { %v1409_v36 = vpop.f32.mrf.mxu1  ;;  %1583 = vst [vmem:[%s2596_s28 + $0x168] sm:$0xff] %v1519_v31  ;;  %1585 = vst [vmem:[%s2596_s28 + $0x178] sm:$0xff] %v1521_v32  ;;  %v1408_v38 = vadd.f32 %v1407_v30, %v1215_v34  ;;  %v1217_v39 = vadd.f32 %v1216_v35, %v2587_v11 }
 0x1b7   : > { %v1220_v40 = vpop.f32.mrf.mxu0 }
 0x1b8   : > { %v1413_v41 = vpop.f32.mrf.mxu1  ;;  %v1466_v43 = vpack.c.bf16 %v1408_v38, %v1404_v37  ;;  %v1410_v44 = vadd.f32 %v1409_v36, %v1217_v39  ;;  %v1221_v50 = vadd.f32 %v1220_v40, %v2585_v8 }
 0x1b9   : > { %v1222_v45 = vpop.f32.mrf.mxu0 }
 0x1ba   : > { %v1415_v46 = vpop.f32.mrf.mxu1  ;;  %v1522_v47 = vunpack.c.l.bf16 %v1466_v43  ;;  %v1524_v48 = vunpack.c.h.bf16 %v1466_v43  ;;  %v1467_v49 = vpack.c.bf16 %v1410_v44, %v1406_v42  ;;  %v1223_v55 = vadd.f32 %v1222_v45, %v2587_v11 }
 0x1bb   : > { %v1224_v51 = vpop.f32.mrf.mxu0  ;;  %v1414_v59 = vadd.f32 %v1413_v41, %v1221_v50 }
 0x1bc   : > { %v1417_v52 = vpop.f32.mrf.mxu1  ;;  %1586 = vst [vmem:[%s2596_s28 + $0x180] sm:$0xff] %v1522_v47  ;;  %1588 = vst [vmem:[%s2596_s28 + $0x190] sm:$0xff] %v1524_v48  ;;  %v1523_v53 = vunpack.c.l.bf16 %v1467_v49  ;;  %v1525_v54 = vunpack.c.h.bf16 %v1467_v49  ;;  %v1225_v56 = vadd.f32 %v1224_v51, %v2585_v8  ;;  %v1416_v0 = vadd.f32 %v1415_v46, %v1223_v55 }
 0x1bd   : > { %v1226_v57 = vpop.f32.mrf.mxu0 }
 0x1be   : > { %v1419_v58 = vpop.f32.mrf.mxu1  ;;  %1587 = vst [vmem:[%s2596_s28 + $0x188] sm:$0xff] %v1523_v53  ;;  %1589 = vst [vmem:[%s2596_s28 + $0x198] sm:$0xff] %v1525_v54  ;;  %v1418_v60 = vadd.f32 %v1417_v52, %v1225_v56  ;;  %v1227_v61 = vadd.f32 %v1226_v57, %v2587_v11 }
 0x1bf   : > { %v1230_v62 = vpop.f32.mrf.mxu0 }
 0x1c0   : > { %v1423_v63 = vpop.f32.mrf.mxu1  ;;  %v1468_v1 = vpack.c.bf16 %v1418_v60, %v1414_v59  ;;  %v1420_v2 = vadd.f32 %v1419_v58, %v1227_v61  ;;  %v1231_v9 = vadd.f32 %v1230_v62, %v2585_v8 }
 0x1c1   : > { %v1232_v3 = vpop.f32.mrf.mxu0 }
 0x1c2   : > { %v1425_v4 = vpop.f32.mrf.mxu1  ;;  %v1526_v5 = vunpack.c.l.bf16 %v1468_v1  ;;  %v1528_v6 = vunpack.c.h.bf16 %v1468_v1  ;;  %v1469_v7 = vpack.c.bf16 %v1420_v2, %v1416_v0  ;;  %v1233_v15 = vadd.f32 %v1232_v3, %v2587_v11 }
 0x1c3   : > { %v1234_v10 = vpop.f32.mrf.mxu0  ;;  %v1424_v19 = vadd.f32 %v1423_v63, %v1231_v9 }
 0x1c4   : > { %v1427_v12 = vpop.f32.mrf.mxu1  ;;  %1590 = vst [vmem:[%s2596_s28 + $0x1a0] sm:$0xff] %v1526_v5  ;;  %1592 = vst [vmem:[%s2596_s28 + $0x1b0] sm:$0xff] %v1528_v6  ;;  %v1527_v13 = vunpack.c.l.bf16 %v1469_v7  ;;  %v1529_v14 = vunpack.c.h.bf16 %v1469_v7  ;;  %v1235_v16 = vadd.f32 %v1234_v10, %v2585_v8  ;;  %v1426_v24 = vadd.f32 %v1425_v4, %v1233_v15 }
 0x1c5   : > { %v1236_v17 = vpop.f32.mrf.mxu0 }
 0x1c6   : > { %v1429_v18 = vpop.f32.mrf.mxu1  ;;  %1591 = vst [vmem:[%s2596_s28 + $0x1a8] sm:$0xff] %v1527_v13  ;;  %1593 = vst [vmem:[%s2596_s28 + $0x1b8] sm:$0xff] %v1529_v14  ;;  %v1428_v20 = vadd.f32 %v1427_v12, %v1235_v16  ;;  %v1237_v21 = vadd.f32 %v1236_v17, %v2587_v11 }
 0x1c7   : > { %v1240_v22 = vpop.f32.mrf.mxu0 }
 0x1c8   : > { %v1433_v23 = vpop.f32.mrf.mxu1  ;;  %v1470_v25 = vpack.c.bf16 %v1428_v20, %v1424_v19  ;;  %v1430_v26 = vadd.f32 %v1429_v18, %v1237_v21  ;;  %v1241_v32 = vadd.f32 %v1240_v22, %v2585_v8 }
 0x1c9   : > { %v1242_v27 = vpop.f32.mrf.mxu0 }
 0x1ca   : > { %v1435_v28 = vpop.f32.mrf.mxu1  ;;  %v1530_v29 = vunpack.c.l.bf16 %v1470_v25  ;;  %v1532_v30 = vunpack.c.h.bf16 %v1470_v25  ;;  %v1471_v31 = vpack.c.bf16 %v1430_v26, %v1426_v24  ;;  %v1243_v37 = vadd.f32 %v1242_v27, %v2587_v11 }
 0x1cb   : > { %v1244_v33 = vpop.f32.mrf.mxu0  ;;  %v1434_v40 = vadd.f32 %v1433_v23, %v1241_v32 }
 0x1cc   : > { %v1437_v34 = vpop.f32.mrf.mxu1  ;;  %1594 = vst [vmem:[%s2596_s28 + $0x1c0] sm:$0xff] %v1530_v29  ;;  %1596 = vst [vmem:[%s2596_s28 + $0x1d0] sm:$0xff] %v1532_v30  ;;  %v1531_v35 = vunpack.c.l.bf16 %v1471_v31  ;;  %v1533_v36 = vunpack.c.h.bf16 %v1471_v31  ;;  %v1245_v38 = vadd.f32 %v1244_v33, %v2585_v8  ;;  %v1436_v44 = vadd.f32 %v1435_v28, %v1243_v37 }
 0x1cd   : > { %v1246_v39 = vpop.f32.mrf.mxu0 }
 0x1ce   : > { %1595 = vst [vmem:[%s2596_s28 + $0x1c8] sm:$0xff] %v1531_v35  ;;  %1597 = vst [vmem:[%s2596_s28 + $0x1d8] sm:$0xff] %v1533_v36  ;;  %v1438_v41 = vadd.f32 %v1437_v34, %v1245_v38  ;;  %v1247_v42 = vadd.f32 %v1246_v39, %v2587_v11  ;;  %v1439_v43 = vpop.f32.mrf.mxu1 }
 0x1d0   : > { %v1472_v45 = vpack.c.bf16 %v1438_v41, %v1434_v40  ;;  %v1440_v46 = vadd.f32 %v1439_v43, %v1247_v42 }
 0x1d2   : > { %v1534_v8 = vunpack.c.l.bf16 %v1472_v45  ;;  %v1536_v47 = vunpack.c.h.bf16 %v1472_v45  ;;  %v1473_v48 = vpack.c.bf16 %v1440_v46, %v1436_v44 }
 0x1d4   : > { %1598 = vst [vmem:[%s2596_s28 + $0x1e0] sm:$0xff] %v1534_v8  ;;  %1600 = vst [vmem:[%s2596_s28 + $0x1f0] sm:$0xff] %v1536_v47  ;;  %v1535_v11 = vunpack.c.l.bf16 %v1473_v48  ;;  %v1537_v49 = vunpack.c.h.bf16 %v1473_v48 }
 0x1d6   : > { %1599 = vst [vmem:[%s2596_s28 + $0x1e8] sm:$0xff] %v1535_v11  ;;  %1601 = vst [vmem:[%s2596_s28 + $0x1f8] sm:$0xff] %v1537_v49 }
 0x1d7   : > { %2261 = shalt.err (!%p2258_p3)
}
 0x1d8   : > { %s2262_s11 = scalar_lea.hbm %s2722_s8, 8192  ;;  %s2266_s6 = scalar_lea.hbm %s2779_s3, 16384 }
 0x1d9   : > { %p2263_p6 = scmp.ne.s32.totalorder %s2722_s8, %s2262_s11  ;;  %p2267_p12 = scmp.lt.s32.totalorder %s2722_s8, %s2779_s3 }
 0x1da   : > { %p2268_p13 = scmp.lt.s32.totalorder %s2266_s6, %s2262_s11 }
 0x1db   : > { %p2264_p9 = pnand %p2263_p6, %p2790_p5 }
 0x1dc   : > { %p2269_p11 = por %p2268_p13, %p2267_p12 }
 0x1dd   : > { %p2265_p8 = pneg %p2264_p9 }
 0x1df   : > { %p2270_p7 = pnand %p2269_p11, %p2265_p8 }
 0x1e1   : > { %2273 = shalt.err (!%p2270_p7)
}
 0x1e2   : > { %s2342_s28 = smov 256   ;;  %s2343_s9 = smov 512  }
 0x1e3   : > { %s2344_s29 = smov 16  }
 0x1e4   : > { %1897 = dma.vmem_to_hbm [thread:$0]  (%p2790_p5), %s2724_s22, 8192, %s2722_s8, %s1603_s15, %s2342_s28, %s2343_s9, %s2344_s29  }
 0x1e5 PF: > { %s1634_s4 = sand.u32 1, %s2312_s12   ;;  %p2791_p10 = scmp.ne.s32.totalorder %s2786_s27, 0 }
 0x1e6   : > { %p2792_p2 = scmp.ge.s32.totalorder %s2332_s17, 2  ;;  %s1635_s7 = scalar_lea.sflag [#allocation4], %s1634_s4 }
 0x1e8   : > { %p1911_p1 = pnand %p2792_p2, %p2791_p10 }
 0x1ea   : > { %p1912_p0 = pneg %p1911_p1 }
 0x1ec   : > { %2307 = dma.done.wait (%p1912_p0), %s1635_s7, 8192  }
 0x1ed   : > { %2309 = vsyncadd (%p1912_p0), %s1635_s7, 4294959104  ;;  %s20_s17 = sadd.s32 1, %s2332_s17   ;;  %s2793_s12 = smov %s2316_s13 }
 0x1ee   : > { %p17_p4 = scmp.ge.s32.totalorder %s20_s17, 4   ;;  %s2794_s13 = smov %s2320_s14 }
 0x1ef   : > { %s2795_s14 = smov %s2416_s24  ;;  %s2796_s15 = smov %s2328_s16 }
 0x1f0   : > { %s2797_s16 = smov %s2799_s18  ;;  %19 = sbr.rel (!%p17_p4) target bundleno = 7 (0x7), region = 94 }
 0x1f5   :  { %1640 = vsyncpa [#allocation3], 1 }
 0x1f6   :  { %1642 = vsyncpa [#allocation3 + $0x1], 1 }
 0x1f7   :  { %1643 = vsyncpa [#allocation6], 1 }
 0x1f8   :  { %1645 = vsyncpa [#allocation6 + $0x1], 1 }
 0x1f9   :  { %1646 = vsyncpa [#allocation4], 1 }
 0x1fa   :  { %1648 = vsyncpa [#allocation4 + $0x1], 1 }

</bundles_post_ra>
